<compile_context>
chip_gen: v7x
topology: tpu7x:2x2x1
jax: 0.10.0
libtpu: 0.0.40
codegen_flags: <defaults>
</compile_context>

<pallas_src>
import jax
import jax.numpy as jnp
from jax.experimental import pallas as pl
from jax.experimental.pallas import tpu as pltpu


def _round_up(v, m):
    return (v + m - 1) // m * m


def _round_down(v, m):
    return (v // m) * m


def residual_add_kernel(y_ref, r_ref, o_ref):
    # The module's own op:  x = network(x); x += res
    o_ref[...] = y_ref[...] + r_ref[...]


@jax.jit
def residual_add_pallas(net_out, res):
    """out = net_out + res (elementwise), any matching shape/dtype."""
    assert net_out.shape == res.shape, (net_out.shape, res.shape)
    assert net_out.dtype == res.dtype, (net_out.dtype, res.dtype)
    orig_shape = net_out.shape
    dtype = net_out.dtype
    itemsize = jnp.dtype(dtype).itemsize

    # Flatten to 2-D (rows, lanes): last tensor dim maps to the 128-lane axis.
    C = orig_shape[-1] if len(orig_shape) >= 1 else 1
    y2 = net_out.reshape(-1, C)
    r2 = res.reshape(-1, C)
    R = y2.shape[0]

    # Packed min-tile sublane multiple: 8 (f32) / 16 (bf16) / 32 (int8/fp8).
    sub = max(8, 32 // itemsize)

    # ~2 MiB per block; 3 operands x 2 pipeline buffers ~= 12 MiB total, which
    # fits the default scoped VMEM on v5e/v6e/v7x without raising limits.
    TARGET_BLOCK_BYTES = 2 * 1024 * 1024

    # Lane tiling only when even a minimum-height full-width block would blow
    # the budget (very wide flattened activations); otherwise keep the block
    # full-width (block last dim == array last dim is always a legal layout).
    if C * itemsize * sub > TARGET_BLOCK_BYTES:
        tile_c = max(128, _round_down(TARGET_BLOCK_BYTES // (sub * itemsize), 128))
        if tile_c >= C:
            tile_c = C
    else:
        tile_c = C

    # Row tile from the byte budget, rounded to the packed sublane multiple.
    row_bytes = tile_c * itemsize
    tile_r = max(sub, _round_down(TARGET_BLOCK_BYTES // row_bytes, sub))
    if R > sub:
        # v7x megacore: keep >= 2 grid steps along the "parallel" row axis so
        # both TensorCores get work; harmless on single-core v5e/v6e.
        tile_r = min(tile_r, _round_up(pl.cdiv(R, 2), sub))
    if tile_r >= R:
        tile_r = R  # single block == full dim is a legal block shape

    grid = (pl.cdiv(R, tile_r), pl.cdiv(C, tile_c))
    block = pl.BlockSpec((tile_r, tile_c), lambda i, j: (i, j))

    cost = pl.CostEstimate(
        flops=R * C,
        transcendentals=0,
        bytes_accessed=3 * R * C * itemsize,
    )

    out = pl.pallas_call(
        residual_add_kernel,
        out_shape=jax.ShapeDtypeStruct((R, C), dtype),
        grid_spec=pltpu.PrefetchScalarGridSpec(
            num_scalar_prefetch=0,
            grid=grid,
            in_specs=[block, block],
            out_specs=block,
        ),
        compiler_params=pltpu.CompilerParams(
            dimension_semantics=("parallel", "parallel"),
        ),
        cost_estimate=cost,
    )(y2, r2)

    return out.reshape(orig_shape)


def residual_add_forward(network_fn, x, **kwargs):
    """Pallas equivalent of ResidualAdd.forward: network(x, **kwargs) + x."""
    # TODO(synk): `self.network` is an arbitrary user-supplied nn.Module; it is
    # evaluated as plain JAX here (only the residual add runs as a Pallas kernel).
    res = x
    y = network_fn(x, **kwargs)
    return residual_add_pallas(y, res)


if __name__ == "__main__":
    key = jax.random.PRNGKey(0)
    k_x, k_w, k_b, k2, k3 = jax.random.split(key, 5)

    # Attention-style usage: x = (batch, seq, d_model).
    batch, seq, d_model = 4, 128, 128
    x = jax.random.normal(k_x, (batch, seq, d_model), jnp.float32)

    # Deterministic stand-in for the wrapped sub-layer.
    w = jax.random.normal(k_w, (d_model, d_model), jnp.float32) / jnp.sqrt(
        jnp.float32(d_model)
    )
    b = jax.random.normal(k_b, (d_model,), jnp.float32) * 0.01
    network_fn = lambda t: jnp.tanh(t @ w + b)

    # Network + residual add inside one jit (keeps net_out out of an extra
    # standalone-call round trip).
    fwd = jax.jit(lambda t: residual_add_forward(network_fn, t))
    out = jax.block_until_ready(fwd(x))
    ref = network_fn(x) + x
    assert out.shape == x.shape and out.dtype == x.dtype
    assert jnp.allclose(out, ref, atol=1e-5, rtol=1e-5), "mismatch vs reference"

    # Ragged shape -> partial (masked) edge blocks; no padding / slicing passes.
    x2 = jax.random.normal(k2, (2, 7, 33), jnp.float32)
    net2 = lambda t: jnp.sin(t) * 0.5
    out2 = jax.block_until_ready(residual_add_forward(net2, x2))
    assert out2.shape == x2.shape
    assert jnp.allclose(out2, net2(x2) + x2, atol=1e-5, rtol=1e-5), "ragged mismatch"

    # bf16 exercises the dtype-aware (16, 128) sublane multiple.
    x3 = jax.random.normal(k3, (2, 48, 64), jnp.bfloat16)
    net3 = lambda t: t * jnp.bfloat16(0.5)
    out3 = jax.block_until_ready(residual_add_forward(net3, x3))
    ref3 = (net3(x3) + x3).astype(jnp.float32)
    assert out3.shape == x3.shape and out3.dtype == x3.dtype
    assert jnp.allclose(out3.astype(jnp.float32), ref3, atol=1e-2, rtol=1e-2), "bf16 mismatch"

    print("KERNEL_OK")
</pallas_src>

<mosaic_0001>
module attributes {stable_mosaic.version = 11 : i64} {
  func.func @residual_add_kernel(%arg0: i32, %arg1: i32, %arg2: memref<256x128xf32, #tpu.memory_space<vmem>>, %arg3: memref<256x128xf32, #tpu.memory_space<vmem>>, %arg4: memref<256x128xf32, #tpu.memory_space<vmem>>) attributes {dimension_semantics = [#tpu.dimension_semantics<parallel>, #tpu.dimension_semantics<parallel>], iteration_bounds = array<i64: 2, 1>, scalar_prefetch = 0 : i64, scratch_operands = 0 : i64, tpu.core_type = #tpu.core_type<tc>, window_params = [{transform_indices = @transform_0, window_bounds = array<i64: 256, 128>}, {transform_indices = @transform_1, window_bounds = array<i64: 256, 128>}, {transform_indices = @transform_2, window_bounds = array<i64: 256, 128>}]} {
    %c0 = arith.constant 0 : index
    %c0_0 = arith.constant 0 : index
    %0 = vector.load %arg2[%c0, %c0_0] : memref<256x128xf32, #tpu.memory_space<vmem>>, vector<256x128xf32>
    %c0_1 = arith.constant 0 : index
    %c0_2 = arith.constant 0 : index
    %1 = vector.load %arg3[%c0_1, %c0_2] : memref<256x128xf32, #tpu.memory_space<vmem>>, vector<256x128xf32>
    %2 = arith.addf %0, %1 : vector<256x128xf32>
    %c0_3 = arith.constant 0 : index
    %c0_4 = arith.constant 0 : index
    %3 = vector.load %arg4[%c0_3, %c0_4] : memref<256x128xf32, #tpu.memory_space<vmem>>, vector<256x128xf32>
    tpu.vector_store %arg4[%c0_3, %c0_4], %2 {strides = array<i32>} : memref<256x128xf32, #tpu.memory_space<vmem>>, vector<256x128xf32>,
    return
  }
  func.func @transform_0(%arg0: i32, %arg1: i32) -> (i32, i32) {
    %c0_i32 = arith.constant 0 : i32
    return %arg0, %arg1 : i32, i32
  }
  func.func @transform_1(%arg0: i32, %arg1: i32) -> (i32, i32) {
    %c0_i32 = arith.constant 0 : i32
    return %arg0, %arg1 : i32, i32
  }
  func.func @transform_2(%arg0: i32, %arg1: i32) -> (i32, i32) {
    %c0_i32 = arith.constant 0 : i32
    return %arg0, %arg1 : i32, i32
  }
}

</mosaic_0001>

<bundles_post_ra>
// kernel: residual_add_pallas.1
= control target key start
LH: loop header
LB: loop body
LE: loop exit
PB: predicated region body
PF: predicated region fallthrough
CT: control target
= control target key end

     0   :  { %7 = vsyncpa [#allocation3], 0  ;;  %s1080_s0 = inlined_call_operand.hbm [shape: f32[512,128], index: 0, kind: input, shape index: {}]   ;;  %s1081_s1 = inlined_call_operand.hbm [shape: f32[512,128], index: 1, kind: input, shape index: {}]   ;;  %s1082_s2 = inlined_call_operand.hbm [shape: f32[512,128], index: 2, kind: output, shape index: {}]  }
   0x1   :  { %9 = vsyncpa [#allocation3 + $0x1], 0 }
   0x2   :  { %10 = vsyncpa [#allocation6], 0 }
   0x3   :  { %12 = vsyncpa [#allocation6 + $0x1], 0 }
   0x4   :  { %13 = vsyncpa [#allocation4], 0 }
   0x5   :  { %15 = vsyncpa [#allocation4 + $0x1], 0  ;;  %s741_s9 = smov 0   ;;  %s743_s10 = smov 0  }
   0x6   :  { %s745_s11 = smov 0   ;;  %s747_s12 = smov 0  }
   0x7   :  { %s749_s13 = smov 0   ;;  %s751_s14 = smov 0  }
   0x8 LB: > { %s478_s15 = sadd.s32 4294967295, %s717_s14   ;;  %s479_s16 = sadd.s32 4294967294, %s717_s14   ;;  %s717_s14 = sphi %s751_s14, %s21_s14   ;;  %s713_s13 = sphi %s749_s13, %s1100_s13   ;;  %s709_s12 = sphi %s747_s12, %s1099_s12   ;;  %s705_s11 = sphi %s745_s11, %s1098_s11   ;;  %s701_s10 = sphi %s743_s10, %s1097_s10   ;;  %s697_s9 = sphi %s741_s9, %s1096_s9  }
   0x9   : > { %s33_s17 = sadd.s32 1, %s713_s13  ;;  %s42_s18 = sadd.s32 1, %s705_s11 }
   0xa   : > { %p35_p0 = scmp.ge.s32.totalorder %s33_s17, 2  ;;  %p49_p1 = scmp.ne.s32.totalorder %s705_s11, %s701_s10 }
   0xb   : > { %p50_p2 = scmp.eq.s32.totalorder %s717_s14, 0  ;;  %p55_p3 = scmp.ne.s32.totalorder %s701_s10, %s697_s9 }
   0xc   : > { %s1102_s17 = smov (%p35_p0, %s33_s17), 0  ;;  %p56_p5 = scmp.eq.s32.totalorder %s478_s15, 0 }
   0xd   : > { %p782_p4 = por %p50_p2, %p49_p1  ;;  %s37_s20 = ssub.s32 %s713_s13, %s1102_s17 }
   0xe   : > { %p109_p6 = scmp.eq.s32.totalorder %s478_s15, 1  ;;  %p40_p7 = scmp.eq.s32.totalorder %s37_s20, 0 }
   0xf   : > { %p788_p8 = por %p56_p5, %p55_p3  ;;  %p115_p10 = scmp.eq.s32.totalorder %s479_s16, 1 }
  0x10   : > { %p792_p9 = por %p109_p6, %p49_p1  ;;  %p517_p13 = scmp.lt.s32.totalorder %s717_s14, 2 }
  0x11   : > { %s1086_s21 = scalar_select %p788_p8, 1, 0 }
  0x12   : > { %s1087_s22 = scalar_select %p792_p9, 1, 0 }
  0x13   : > { %s797_s23 = scalar_select %p40_p7, %s705_s11, %s42_s18  }
  0x14   : > { %p799_p11 = por %p115_p10, %p55_p3  ;;  %s806_s25 = sand.u32 1, %s705_s11  }
  0x15   : > { %s482_s26 = sshll.u32 %s806_s25, 8  ;;  %s497_s27 = sshll.u32 %s713_s13, 12 }
  0x16   : > { %s1088_s24 = scalar_select %p799_p11, 1, 0 }
  0x17   : > { %s815_s30 = scalar_lea.hbm %s1080_s0, %s497_s27  ;;  %s139_s3 = scalar_lea.vmem [#allocation2], %s482_s26 }
  0x18   : > { %s147_s4 = sshll.u32 %s139_s3, 4  ;;  %p823_p0 = pnand %p517_p13, %p782_p4  ;;  %s819_s4 = int_to_ptr.vmem [resolvable:$true] %s147_s4 }
  0x19   : > { %s136_s6 = scalar_lea.sflag [#allocation3], %s806_s25  ;;  %s571_s7 = scalar_lea.hbm %s815_s30, 4096 }
  0x1a   : > { %p572_p2 = scmp.ne.s32.totalorder %s815_s30, %s571_s7  ;;  %p573_p3 = pneg %p823_p0 }
  0x1b   : > { %s576_s16 = scalar_lea.hbm %s1080_s0, 8192  ;;  %p577_p4 = scmp.lt.u32.totalorder %s815_s30, %s1080_s0 }
  0x1c   : > { %p574_p5 = pnand %p573_p3, %p572_p2  ;;  %p578_p7 = scmp.lt.u32.totalorder %s576_s16, %s571_s7 }
  0x1d   : > { %p580_p13 = scmp.lt.u32.totalorder %s571_s7, %s815_s30 }
  0x1e   : > { %p575_p6 = pneg %p574_p5  ;;  %p579_p10 = por %p578_p7, %p577_p4 }
  0x20   : > { %p581_p12 = por %p580_p13, %p579_p10 }
  0x22   : > { %p582_p1 = pnand %p581_p12, %p575_p6 }
  0x24   : > { %585 = shalt.err (!%p582_p1)
}
  0x25   : > { %s586_s20 = scalar_lea.vmem %s819_s4, 4096  ;;  %s719_s28 = smov [#allocation2]  }
  0x26   : > { %p587_p2 = scmp.ne.s32.totalorder %s819_s4, %s586_s20  ;;  %s591_s29 = sshll.u32 %s719_s28, 4  ;;  %s592_s29 = int_to_ptr.vmem [resolvable:$false] %s591_s29 }
  0x27   : > { %s593_s3 = scalar_lea.vmem %s592_s29, 8192  ;;  %p594_p9 = scmp.lt.s32.totalorder %s819_s4, %s592_s29 }
  0x28   : > { %p589_p5 = pnand %p587_p2, %p573_p3  ;;  %p595_p4 = scmp.lt.s32.totalorder %s593_s3, %s586_s20 }
  0x2a   : > { %p590_p11 = pneg %p589_p5  ;;  %p596_p7 = por %p595_p4, %p594_p9 }
  0x2c   : > { %p597_p10 = pnand %p596_p7, %p590_p11 }
  0x2e   : > { %600 = shalt.err (!%p597_p10)
}
  0x2f   : > { %s720_s7 = smov 128   ;;  %s721_s8 = smov 8  }
  0x30   : > { %509 = dma.hbm_to_vmem [thread:$0]  (!%p823_p0), %s815_s30, 4096, %s819_s4, %s136_s6, %s720_s7, %s720_s7, %s721_s8  }
  0x31   : > { %p177_p9 = scmp.lt.s32.totalorder %s717_s14, 3  ;;  %s865_s18 = scalar_lea.hbm %s1081_s1, %s497_s27 }
  0x32   : > { %p1090_p11 = scmp.ge.s32.totalorder %s717_s14, 1  ;;  %s161_s20 = scalar_lea.vmem [#allocation5], %s482_s26 }
  0x33   : > { %s169_s28 = sshll.u32 %s161_s20, 4  ;;  %s158_s30 = scalar_lea.sflag [#allocation6], %s806_s25  ;;  %s875_s28 = int_to_ptr.vmem [resolvable:$true] %s169_s28 }
  0x34   : > { %p869_p12 = pnand %p1090_p11, %p177_p9  ;;  %s601_s4 = scalar_lea.hbm %s865_s18, 4096 }
  0x35   : > { %p602_p1 = scmp.ne.s32.totalorder %s865_s18, %s601_s4  ;;  %s606_s29 = scalar_lea.hbm %s1081_s1, 8192 }
  0x36   : > { %p607_p2 = scmp.lt.u32.totalorder %s865_s18, %s1081_s1  ;;  %p608_p5 = scmp.lt.u32.totalorder %s606_s29, %s601_s4 }
  0x37   : > { %p604_p6 = pnand %p602_p1, %p573_p3  ;;  %p610_p7 = scmp.lt.u32.totalorder %s601_s4, %s865_s18 }
  0x38   : > { %p609_p4 = por %p608_p5, %p607_p2 }
  0x39   : > { %p605_p13 = pneg %p604_p6 }
  0x3a   : > { %p611_p10 = por %p610_p7, %p609_p4 }
  0x3c   : > { %p612_p9 = pnand %p611_p10, %p605_p13 }
  0x3e   : > { %615 = shalt.err (!%p612_p9)
}
  0x3f   : > { %s616_s26 = scalar_lea.vmem %s875_s28, 4096  ;;  %s722_s16 = smov [#allocation5]  }
  0x40   : > { %p617_p11 = scmp.ne.s32.totalorder %s875_s28, %s616_s26  ;;  %s621_s20 = sshll.u32 %s722_s16, 4  ;;  %s622_s20 = int_to_ptr.vmem [resolvable:$false] %s621_s20 }
  0x41   : > { %s623_s27 = scalar_lea.vmem %s622_s20, 8192  ;;  %p624_p8 = scmp.lt.s32.totalorder %s875_s28, %s622_s20 }
  0x42   : > { %p619_p1 = pnand %p617_p11, %p573_p3  ;;  %p625_p2 = scmp.lt.s32.totalorder %s623_s27, %s616_s26 }
  0x44   : > { %p620_p6 = pneg %p619_p1  ;;  %p626_p5 = por %p625_p2, %p624_p8 }
  0x46   : > { %p627_p4 = pnand %p626_p5, %p620_p6 }
  0x48   : > { %630 = shalt.err (!%p627_p4)
}
  0x49   : > { %512 = dma.hbm_to_vmem [thread:$0]  (!%p823_p0), %s865_s18, 4096, %s875_s28, %s158_s30, %s720_s7, %s720_s7, %s721_s8  }
  0x4a   : > { %181 = sbr.rel (%p869_p12) target bundleno = 126 (0x7e), region = 28  ;;  %s909_s4 = sand.u32 (!%p869_p12), 1, %s701_s10  }
  0x4b   : > { %s489_s6 = sshll.u32 (!%p869_p12), %s909_s4, 8  ;;  %s184_s29 = scalar_lea.sflag (!%p869_p12), [#allocation3], %s909_s4 }
  0x4c   : > { %s913_s5 = scalar_lea.vmem (!%p869_p12), [#allocation2], %s489_s6  ;;  %p1092_p8 = scmp.ne.s32.totalorder (!%p869_p12), %s1086_s21, 0 }
  0x51   : > { %684 = dma.done.wait (%p1092_p8), %s184_s29, 4096  }
  0x52   : > { %686 = vsyncadd (%p1092_p8), %s184_s29, 4294963200  ;;  %s193_s25 = scalar_lea.sflag [#allocation6], %s909_s4  ;;  %s920_s7 = scalar_lea.vmem [#allocation5], %s489_s6 }
  0x53   : > { %688 = dma.done.wait (%p1092_p8), %s193_s25, 4096  }
  0x54   : > { %690 = vsyncadd (%p1092_p8), %s193_s25, 4294963200  ;;  %v225_v0 = vld [vmem:[%s913_s5] sm:$0xff]  ;;  %v226_v2 = vld [vmem:[%s913_s5 + $0x8] sm:$0xff]  ;;  %s935_s21 = scalar_lea.vmem [#allocation7], %s489_s6  ;;  %s499_s8 = sshll.u32 %s709_s12, 12 }
  0x55   : > { %v257_v1 = vld [vmem:[%s920_s7] sm:$0xff]  ;;  %v258_v4 = vld [vmem:[%s920_s7 + $0x8] sm:$0xff]  ;;  %v227_v5 = vld [vmem:[%s913_s5 + $0x10] sm:$0xff]  ;;  %s368_s18 = sshll.u32 %s935_s21, 4  ;;  %s1025_s28 = scalar_lea.hbm %s1082_s2, %s499_s8  ;;  %s1027_s18 = int_to_ptr.vmem [resolvable:$true] %s368_s18 }
  0x56   : > { %v289_v3 = vadd.f32 %v257_v1, %v225_v0  ;;  %v259_v6 = vld [vmem:[%s920_s7 + $0x10] sm:$0xff]  ;;  %v290_v7 = vadd.f32 %v258_v4, %v226_v2  ;;  %v228_v9 = vld [vmem:[%s913_s5 + $0x18] sm:$0xff]  ;;  %v229_v11 = vld [vmem:[%s913_s5 + $0x20] sm:$0xff]  ;;  %s354_s30 = scalar_lea.sflag [#allocation4], %s909_s4  ;;  %s631_s3 = scalar_lea.vmem %s1027_s18, 4096 }
  0x57   : > { %v291_v8 = vadd.f32 %v259_v6, %v227_v5  ;;  %v260_v10 = vld [vmem:[%s920_s7 + $0x18] sm:$0xff]  ;;  %v261_v13 = vld [vmem:[%s920_s7 + $0x20] sm:$0xff]  ;;  %v230_v14 = vld [vmem:[%s913_s5 + $0x28] sm:$0xff]  ;;  %p632_p0 = scmp.ne.s32.totalorder %s1027_s18, %s631_s3  ;;  %p1093_p3 = scmp.ne.s32.totalorder %s1087_s22, 0 }
  0x58   : > { %321 = vst [vmem:[%s935_s21] sm:$0xff] %v289_v3  ;;  %v292_v12 = vadd.f32 %v260_v10, %v228_v9  ;;  %v262_v15 = vld [vmem:[%s920_s7 + $0x28] sm:$0xff]  ;;  %322 = vst [vmem:[%s935_s21 + $0x8] sm:$0xff] %v290_v7  ;;  %v293_v16 = vadd.f32 %v261_v13, %v229_v11  ;;  %v231_v18 = vld [vmem:[%s913_s5 + $0x30] sm:$0xff]  ;;  %s723_s15 = smov [#allocation7]  }
  0x59   : > { %323 = vst [vmem:[%s935_s21 + $0x10] sm:$0xff] %v291_v8  ;;  %v294_v17 = vadd.f32 %v262_v15, %v230_v14  ;;  %v263_v19 = vld [vmem:[%s920_s7 + $0x30] sm:$0xff]  ;;  %v232_v20 = vld [vmem:[%s913_s5 + $0x38] sm:$0xff]  ;;  %v233_v23 = vld [vmem:[%s913_s5 + $0x40] sm:$0xff]  ;;  %p633_p12 = pnand %p632_p0, %p1093_p3  ;;  %s635_s26 = sshll.u32 %s723_s15, 4  ;;  %s636_s26 = int_to_ptr.vmem [resolvable:$false] %s635_s26 }
  0x5a   : > { %324 = vst [vmem:[%s935_s21 + $0x18] sm:$0xff] %v292_v12  ;;  %v295_v21 = vadd.f32 %v263_v19, %v231_v18  ;;  %v264_v22 = vld [vmem:[%s920_s7 + $0x38] sm:$0xff]  ;;  %v265_v24 = vld [vmem:[%s920_s7 + $0x40] sm:$0xff]  ;;  %325 = vst [vmem:[%s935_s21 + $0x20] sm:$0xff] %v293_v16  ;;  %s637_s16 = scalar_lea.vmem %s636_s26, 8192  ;;  %p638_p7 = scmp.lt.s32.totalorder %s1027_s18, %s636_s26 }
  0x5b   : > { %326 = vst [vmem:[%s935_s21 + $0x28] sm:$0xff] %v294_v17  ;;  %v296_v25 = vadd.f32 %v264_v22, %v232_v20  ;;  %v297_v26 = vadd.f32 %v265_v24, %v233_v23  ;;  %v234_v27 = vld [vmem:[%s913_s5 + $0x48] sm:$0xff]  ;;  %v235_v29 = vld [vmem:[%s913_s5 + $0x50] sm:$0xff]  ;;  %v236_v32 = vld [vmem:[%s913_s5 + $0x58] sm:$0xff]  ;;  %p634_p13 = pneg %p633_p12  ;;  %p639_p10 = scmp.lt.s32.totalorder %s637_s16, %s631_s3 }
  0x5c   : > { %v266_v28 = vld [vmem:[%s920_s7 + $0x48] sm:$0xff]  ;;  %327 = vst [vmem:[%s935_s21 + $0x30] sm:$0xff] %v295_v21  ;;  %v267_v31 = vld [vmem:[%s920_s7 + $0x50] sm:$0xff]  ;;  %v268_v33 = vld [vmem:[%s920_s7 + $0x58] sm:$0xff] }
  0x5d   : > { %v298_v30 = vadd.f32 %v266_v28, %v234_v27  ;;  %328 = vst [vmem:[%s935_s21 + $0x38] sm:$0xff] %v296_v25  ;;  %329 = vst [vmem:[%s935_s21 + $0x40] sm:$0xff] %v297_v26  ;;  %v299_v34 = vadd.f32 %v267_v31, %v235_v29  ;;  %v300_v35 = vadd.f32 %v268_v33, %v236_v32  ;;  %v237_v36 = vld [vmem:[%s913_s5 + $0x60] sm:$0xff]  ;;  %v238_v38 = vld [vmem:[%s913_s5 + $0x68] sm:$0xff]  ;;  %p640_p9 = por %p639_p10, %p638_p7 }
  0x5e   : > { %v269_v37 = vld [vmem:[%s920_s7 + $0x60] sm:$0xff]  ;;  %v270_v40 = vld [vmem:[%s920_s7 + $0x68] sm:$0xff]  ;;  %v239_v41 = vld [vmem:[%s913_s5 + $0x70] sm:$0xff] }
  0x5f   : > { %330 = vst [vmem:[%s935_s21 + $0x48] sm:$0xff] %v298_v30  ;;  %v301_v39 = vadd.f32 %v269_v37, %v237_v36  ;;  %v271_v42 = vld [vmem:[%s920_s7 + $0x70] sm:$0xff]  ;;  %331 = vst [vmem:[%s935_s21 + $0x50] sm:$0xff] %v299_v34  ;;  %v302_v43 = vadd.f32 %v270_v40, %v238_v38  ;;  %v240_v45 = vld [vmem:[%s913_s5 + $0x78] sm:$0xff]  ;;  %p641_p11 = pnand %p640_p9, %p634_p13 }
  0x60   : > { %332 = vst [vmem:[%s935_s21 + $0x58] sm:$0xff] %v300_v35  ;;  %v303_v44 = vadd.f32 %v271_v42, %v239_v41  ;;  %v272_v46 = vld [vmem:[%s920_s7 + $0x78] sm:$0xff]  ;;  %v241_v47 = vld [vmem:[%s913_s5 + $0x80] sm:$0xff]  ;;  %v242_v50 = vld [vmem:[%s913_s5 + $0x88] sm:$0xff] }
  0x61   : > { %333 = vst [vmem:[%s935_s21 + $0x60] sm:$0xff] %v301_v39  ;;  %v304_v48 = vadd.f32 %v272_v46, %v240_v45  ;;  %v273_v49 = vld [vmem:[%s920_s7 + $0x80] sm:$0xff]  ;;  %v274_v51 = vld [vmem:[%s920_s7 + $0x88] sm:$0xff]  ;;  %334 = vst [vmem:[%s935_s21 + $0x68] sm:$0xff] %v302_v43 }
  0x62   : > { %335 = vst [vmem:[%s935_s21 + $0x70] sm:$0xff] %v303_v44  ;;  %v305_v52 = vadd.f32 %v273_v49, %v241_v47  ;;  %v306_v53 = vadd.f32 %v274_v51, %v242_v50  ;;  %v243_v54 = vld [vmem:[%s913_s5 + $0x90] sm:$0xff]  ;;  %v244_v56 = vld [vmem:[%s913_s5 + $0x98] sm:$0xff]  ;;  %v245_v59 = vld [vmem:[%s913_s5 + $0xa0] sm:$0xff] }
  0x63   : > { %v275_v55 = vld [vmem:[%s920_s7 + $0x90] sm:$0xff]  ;;  %336 = vst [vmem:[%s935_s21 + $0x78] sm:$0xff] %v304_v48  ;;  %v276_v58 = vld [vmem:[%s920_s7 + $0x98] sm:$0xff]  ;;  %v277_v60 = vld [vmem:[%s920_s7 + $0xa0] sm:$0xff] }
  0x64   : > { %v307_v57 = vadd.f32 %v275_v55, %v243_v54  ;;  %337 = vst [vmem:[%s935_s21 + $0x80] sm:$0xff] %v305_v52  ;;  %338 = vst [vmem:[%s935_s21 + $0x88] sm:$0xff] %v306_v53  ;;  %v308_v61 = vadd.f32 %v276_v58, %v244_v56  ;;  %v309_v62 = vadd.f32 %v277_v60, %v245_v59  ;;  %v246_v63 = vld [vmem:[%s913_s5 + $0xa8] sm:$0xff]  ;;  %v247_v1 = vld [vmem:[%s913_s5 + $0xb0] sm:$0xff] }
  0x65   : > { %v278_v0 = vld [vmem:[%s920_s7 + $0xa8] sm:$0xff]  ;;  %v279_v3 = vld [vmem:[%s920_s7 + $0xb0] sm:$0xff]  ;;  %v248_v4 = vld [vmem:[%s913_s5 + $0xb8] sm:$0xff] }
  0x66   : > { %339 = vst [vmem:[%s935_s21 + $0x90] sm:$0xff] %v307_v57  ;;  %v310_v2 = vadd.f32 %v278_v0, %v246_v63  ;;  %v280_v5 = vld [vmem:[%s920_s7 + $0xb8] sm:$0xff]  ;;  %340 = vst [vmem:[%s935_s21 + $0x98] sm:$0xff] %v308_v61  ;;  %v311_v6 = vadd.f32 %v279_v3, %v247_v1  ;;  %v249_v8 = vld [vmem:[%s913_s5 + $0xc0] sm:$0xff] }
  0x67   : > { %341 = vst [vmem:[%s935_s21 + $0xa0] sm:$0xff] %v309_v62  ;;  %v312_v7 = vadd.f32 %v280_v5, %v248_v4  ;;  %v281_v9 = vld [vmem:[%s920_s7 + $0xc0] sm:$0xff]  ;;  %v250_v10 = vld [vmem:[%s913_s5 + $0xc8] sm:$0xff]  ;;  %v251_v13 = vld [vmem:[%s913_s5 + $0xd0] sm:$0xff] }
  0x68   : > { %342 = vst [vmem:[%s935_s21 + $0xa8] sm:$0xff] %v310_v2  ;;  %v313_v11 = vadd.f32 %v281_v9, %v249_v8  ;;  %v282_v12 = vld [vmem:[%s920_s7 + $0xc8] sm:$0xff]  ;;  %v283_v14 = vld [vmem:[%s920_s7 + $0xd0] sm:$0xff]  ;;  %343 = vst [vmem:[%s935_s21 + $0xb0] sm:$0xff] %v311_v6 }
  0x69   : > { %344 = vst [vmem:[%s935_s21 + $0xb8] sm:$0xff] %v312_v7  ;;  %v314_v15 = vadd.f32 %v282_v12, %v250_v10  ;;  %v315_v16 = vadd.f32 %v283_v14, %v251_v13  ;;  %v252_v17 = vld [vmem:[%s913_s5 + $0xd8] sm:$0xff]  ;;  %v253_v19 = vld [vmem:[%s913_s5 + $0xe0] sm:$0xff]  ;;  %v254_v22 = vld [vmem:[%s913_s5 + $0xe8] sm:$0xff] }
  0x6a   : > { %v284_v18 = vld [vmem:[%s920_s7 + $0xd8] sm:$0xff]  ;;  %345 = vst [vmem:[%s935_s21 + $0xc0] sm:$0xff] %v313_v11  ;;  %v285_v21 = vld [vmem:[%s920_s7 + $0xe0] sm:$0xff]  ;;  %v286_v23 = vld [vmem:[%s920_s7 + $0xe8] sm:$0xff] }
  0x6b   : > { %v316_v20 = vadd.f32 %v284_v18, %v252_v17  ;;  %346 = vst [vmem:[%s935_s21 + $0xc8] sm:$0xff] %v314_v15  ;;  %347 = vst [vmem:[%s935_s21 + $0xd0] sm:$0xff] %v315_v16  ;;  %v317_v24 = vadd.f32 %v285_v21, %v253_v19  ;;  %v318_v25 = vadd.f32 %v286_v23, %v254_v22  ;;  %v255_v26 = vld [vmem:[%s913_s5 + $0xf0] sm:$0xff]  ;;  %v256_v28 = vld [vmem:[%s913_s5 + $0xf8] sm:$0xff] }
  0x6c   : > { %v287_v27 = vld [vmem:[%s920_s7 + $0xf0] sm:$0xff]  ;;  %v288_v30 = vld [vmem:[%s920_s7 + $0xf8] sm:$0xff] }
  0x6d   : > { %348 = vst [vmem:[%s935_s21 + $0xd8] sm:$0xff] %v316_v20  ;;  %v319_v29 = vadd.f32 %v287_v27, %v255_v26  ;;  %349 = vst [vmem:[%s935_s21 + $0xe0] sm:$0xff] %v317_v24  ;;  %v320_v31 = vadd.f32 %v288_v30, %v256_v28 }
  0x6e   : > { %350 = vst [vmem:[%s935_s21 + $0xe8] sm:$0xff] %v318_v25 }
  0x6f   : > { %351 = vst [vmem:[%s935_s21 + $0xf0] sm:$0xff] %v319_v29  ;;  %352 = vst [vmem:[%s935_s21 + $0xf8] sm:$0xff] %v320_v31 }
  0x70   : > { %644 = shalt.err (!%p641_p11)
}
  0x71   : > { %s645_s20 = scalar_lea.hbm %s1025_s28, 4096  ;;  %s649_s29 = scalar_lea.hbm %s1082_s2, 8192 }
  0x72   : > { %p646_p1 = scmp.ne.s32.totalorder %s1025_s28, %s645_s20  ;;  %p650_p5 = scmp.lt.u32.totalorder %s1025_s28, %s1082_s2 }
  0x73   : > { %p651_p4 = scmp.lt.u32.totalorder %s649_s29, %s645_s20  ;;  %p653_p0 = scmp.lt.u32.totalorder %s645_s20, %s1025_s28 }
  0x74   : > { %p647_p6 = pnand %p646_p1, %p1093_p3 }
  0x75   : > { %p652_p8 = por %p651_p4, %p650_p5 }
  0x76   : > { %p648_p2 = pneg %p647_p6 }
  0x77   : > { %p654_p12 = por %p653_p0, %p652_p8 }
  0x79   : > { %p655_p13 = pnand %p654_p12, %p648_p2 }
  0x7b   : > { %658 = shalt.err (!%p655_p13)
}
  0x7c   : > { %s724_s7 = smov 128   ;;  %s725_s21 = smov 8  }
  0x7d   : > { %504 = dma.vmem_to_hbm [thread:$0]  (%p1093_p3), %s1027_s18, 4096, %s1025_s28, %s354_s30, %s724_s7, %s724_s7, %s725_s21  }
  0x7e PF: > { %s383_s8 = sand.u32 1, %s697_s9   ;;  %p1094_p7 = scmp.ne.s32.totalorder %s1088_s24, 0 }
  0x7f   : > { %p1095_p10 = scmp.ge.s32.totalorder %s717_s14, 2  ;;  %s384_s12 = scalar_lea.sflag [#allocation4], %s383_s8 }
  0x81   : > { %p514_p9 = pnand %p1095_p10, %p1094_p7 }
  0x83   : > { %692 = dma.done.wait (!%p514_p9), %s384_s12, 4096  }
  0x84   : > { %694 = vsyncadd (!%p514_p9), %s384_s12, 4294963200  ;;  %s21_s14 = sadd.s32 1, %s717_s14   ;;  %s1096_s9 = smov %s701_s10 }
  0x85   : > { %p18_p11 = scmp.ge.s32.totalorder %s21_s14, 4   ;;  %s1097_s10 = smov %s705_s11 }
  0x86   : > { %s1098_s11 = smov %s797_s23  ;;  %s1099_s12 = smov %s713_s13 }
  0x87   : > { %s1100_s13 = smov %s1102_s17  ;;  %20 = sbr.rel (!%p18_p11) target bundleno = 8 (0x8), region = 86 }
  0x8e   :  { %389 = vsyncpa [#allocation3], 1 }
  0x8f   :  { %391 = vsyncpa [#allocation3 + $0x1], 1 }
  0x90   :  { %392 = vsyncpa [#allocation6], 1 }
  0x91   :  { %394 = vsyncpa [#allocation6 + $0x1], 1 }
  0x92   :  { %395 = vsyncpa [#allocation4], 1 }
  0x93   :  { %397 = vsyncpa [#allocation4 + $0x1], 1 }

</bundles_post_ra>
